<compile_context>
chip_gen: v7x
topology: tpu7x:2x2x1
jax: 0.10.0
libtpu: 0.0.40
codegen_flags: <defaults>
</compile_context>

<pallas_src>
import functools

import jax
import jax.numpy as jnp
from jax.experimental import pallas as pl
from jax.experimental.pallas import tpu as pltpu


def _round_up(x: int, m: int) -> int:
    return (x + m - 1) // m * m


# ---------------------------------------------------------------------------
# Fused Pallas kernel: the whole MLP for one tile of rows.
# ---------------------------------------------------------------------------
def _fused_mlp_kernel(*refs, layer_takes_skip, has_out):
    """refs = (x_ref, *param_refs, o_ref).

    param_refs layout, in order:
      per hidden layer j:  (wx_j, wh_j, b_j)  if layer_takes_skip[j]
                           (w_j,  b_j)        otherwise
      then (w_out, b_out) if has_out.
    """
    x_ref = refs[0]
    o_ref = refs[-1]
    params = refs[1:-1]

    x = x_ref[...]
    h = None
    idx = 0
    for takes_skip in layer_takes_skip:
        if takes_skip:
            wx_ref, wh_ref, b_ref = params[idx], params[idx + 1], params[idx + 2]
            idx += 3
            # Split matmul == Linear applied to concat([x, h], axis=-1); both dots
            # feed the same f32 accumulator, no cross-lane concat needed.
            y = jnp.dot(x, wx_ref[...], preferred_element_type=jnp.float32)
            y = y + jnp.dot(h, wh_ref[...], preferred_element_type=jnp.float32)
        else:
            w_ref, b_ref = params[idx], params[idx + 1]
            idx += 2
            inp = x if h is None else h
            y = jnp.dot(inp, w_ref[...], preferred_element_type=jnp.float32)
        h = jnp.maximum(y + b_ref[...], 0.0)  # bias + ReLU on the VPU, f32

    if has_out:
        w_ref, b_ref = params[idx], params[idx + 1]
        h = jnp.dot(h, w_ref[...], preferred_element_type=jnp.float32) + b_ref[...]

    o_ref[...] = h.astype(o_ref.dtype)


# ---------------------------------------------------------------------------
# Wrapper: one pallas_call for the whole MLP, tiled over rows.
# ---------------------------------------------------------------------------
def mlp_forward(params, input_x, *, skips, tile_n=1024, pad_out_lanes=False):
    """input_x: (..., in_ch). Returns (..., out_ch) (or (..., width) if no net_out)."""
    lead_shape = input_x.shape[:-1]
    in_ch = input_x.shape[-1]
    x2d = input_x.reshape(-1, in_ch)  # flatten leading dims -> (N, in_ch)
    n_rows = x2d.shape[0]

    net = params["net"]
    net_out = params["net_out"]
    depth = len(net)
    has_out = net_out is not None

    # A skip AFTER the last hidden layer is a shape mismatch with net_out in the
    # original torch module as well; not supported here.
    if any(s < 0 or s >= depth - 1 for s in skips):
        raise NotImplementedError("skip index >= depth-1 is not supported")

    # net layer j consumes concat([x, h]) iff (j-1) in skips (same as torch forward).
    layer_takes_skip = tuple(j >= 1 and (j - 1) in skips for j in range(depth))

    # Output feature dim; optionally lane-pad to a multiple of 128 for an unmasked
    # lane-dense store (narrowed back with an XLA slice below).
    out_dim = net_out[0].shape[1] if has_out else net[-1][0].shape[1]
    out_store = _round_up(out_dim, 128) if pad_out_lanes else out_dim

    # Flatten params into the kernel argument list, splitting skip-layer weights so
    # concat([x, h]) @ W becomes x @ W[:in_ch] + h @ W[in_ch:] inside the kernel.
    flat_args = []
    flops_per_row = 0
    weight_bytes = 0
    for j, (w, b) in enumerate(net):
        if layer_takes_skip[j]:
            flat_args += [w[:in_ch], w[in_ch:], b]
        else:
            flat_args += [w, b]
        flops_per_row += 2 * w.shape[0] * w.shape[1]
        weight_bytes += w.size * w.dtype.itemsize + b.size * b.dtype.itemsize
    if has_out:
        w_out, b_out = net_out
        flat_args += [w_out, b_out]
        flops_per_row += 2 * w_out.shape[0] * w_out.shape[1]
        weight_bytes += w_out.size * w_out.dtype.itemsize + b_out.size * b_out.dtype.itemsize

    # Zero-pad the output-producing layer's weight/bias columns if lane-padding.
    if out_store != out_dim:
        pad = out_store - out_dim
        n_tail = 2 if (has_out or not layer_takes_skip[-1]) else 3
        tail = [jnp.pad(t, ((0, 0), (0, pad))) for t in flat_args[-n_tail:]]
        flat_args = flat_args[:-n_tail] + tail

    # Row tiling: bounds per-tile VMEM regardless of N and enables double-buffered
    # DMA/compute overlap across grid steps.
    tile_n = max(8, _round_up(int(tile_n), 8))
    tile_rows = min(tile_n, _round_up(n_rows, 8))
    n_pad = _round_up(n_rows, tile_rows)
    if n_pad != n_rows:
        x2d = jnp.pad(x2d, ((0, n_pad - n_rows), (0, 0)))

    kernel = functools.partial(
        _fused_mlp_kernel, layer_takes_skip=layer_takes_skip, has_out=has_out
    )

    itemsize = x2d.dtype.itemsize
    cost = pl.CostEstimate(
        flops=flops_per_row * n_rows,
        transcendentals=0,
        bytes_accessed=n_rows * in_ch * itemsize
        + n_rows * out_store * itemsize
        + weight_bytes,
    )

    out = pl.pallas_call(
        kernel,
        out_shape=jax.ShapeDtypeStruct((n_pad, out_store), x2d.dtype),
        grid=(n_pad // tile_rows,),
        in_specs=[pl.BlockSpec((tile_rows, in_ch), lambda i: (i, 0))]
        + [
            # Constant block index -> weights/biases stay resident in VMEM, no
            # re-DMA per row tile.
            pl.BlockSpec(p.shape, lambda i: (0, 0))
            for p in flat_args
        ],
        out_specs=pl.BlockSpec((tile_rows, out_store), lambda i: (i, 0)),
        compiler_params=pltpu.CompilerParams(
            # Row tiles are independent -> shard across both v7x TensorCores.
            dimension_semantics=("parallel",),
        ),
        cost_estimate=cost,
    )(x2d, *flat_args)

    out = out[:n_rows, :out_dim]  # drop row padding and lane padding (XLA slice)
    return out.reshape(*lead_shape, out_dim)


# ---------------------------------------------------------------------------
# Parameter construction (deterministic, PyTorch-default-style init)
# ---------------------------------------------------------------------------
def init_linear(key, in_features, out_features, dtype=jnp.float32):
    kw, kb = jax.random.split(key)
    bound = 1.0 / jnp.sqrt(jnp.float32(in_features))
    # Stored as (in_features, out_features) == PyTorch weight.T
    w = jax.random.uniform(kw, (in_features, out_features), dtype, -bound, bound)
    b = jax.random.uniform(kb, (1, out_features), dtype, -bound, bound)
    return w, b


def init_mlp_params(key, in_ch, depth, width, out_ch, skips):
    params = {"net": [], "net_out": None}
    keys = jax.random.split(key, depth + 1)
    params["net"].append(init_linear(keys[0], in_ch, width))
    for i in range(depth - 1):
        in_channels = width + (in_ch if i in skips else 0)
        params["net"].append(init_linear(keys[i + 1], in_channels, width))
    if out_ch > 0:
        params["net_out"] = init_linear(keys[depth], width, out_ch)
    return params


# ---------------------------------------------------------------------------
# Pure-JAX reference for correctness checking
# ---------------------------------------------------------------------------
def mlp_forward_ref(params, input_x, *, skips):
    h = input_x
    for i, (w, b) in enumerate(params["net"]):
        h = jnp.maximum(h @ w + b[0], 0.0)
        if i in skips:
            h = jnp.concatenate([input_x, h], axis=-1)
    if params["net_out"] is not None:
        w, b = params["net_out"]
        h = h @ w + b[0]
    return h


if __name__ == "__main__":
    key = jax.random.PRNGKey(0)
    k_param, k_x, k_b = jax.random.split(key, 3)

    # Config A (exercises the skip path): in_ch=4, depth=3, width=32, out_ch=8, skips=(1,)
    in_ch, depth, width, out_ch = 4, 3, 32, 8
    skips = (1,)
    params = init_mlp_params(k_param, in_ch, depth, width, out_ch, skips)
    x = jax.random.normal(k_x, (2, 8, in_ch), dtype=jnp.float32)

    out = jax.block_until_ready(mlp_forward(params, x, skips=skips))
    ref = mlp_forward_ref(params, x, skips=skips)
    assert out.shape == (2, 8, out_ch), out.shape
    assert jnp.allclose(out, ref, atol=1e-5, rtol=1e-5), "mismatch vs reference (A)"

    # Same config: multi-tile grid + lane-dense (128-padded) output store path.
    out2 = jax.block_until_ready(
        mlp_forward(params, x, skips=skips, tile_n=8, pad_out_lanes=True)
    )
    assert out2.shape == (2, 8, out_ch), out2.shape
    assert jnp.allclose(out2, ref, atol=1e-5, rtol=1e-5), "mismatch vs reference (A, padded)"

    # Config B: no output projection, no skips, ragged row count (exercises row padding).
    params_b = init_mlp_params(k_b, 4, 2, 32, 0, ())
    x_b = jax.random.normal(jax.random.PRNGKey(1), (3, 5, 4), dtype=jnp.float32)
    out_b = jax.block_until_ready(mlp_forward(params_b, x_b, skips=()))
    ref_b = mlp_forward_ref(params_b, x_b, skips=())
    assert out_b.shape == (3, 5, 32), out_b.shape
    assert jnp.allclose(out_b, ref_b, atol=1e-5, rtol=1e-5), "mismatch vs reference (B)"

    print("KERNEL_OK")
</pallas_src>

<mosaic_0001>
module attributes {stable_mosaic.version = 11 : i64} {
  func.func @_fused_mlp_kernel(%arg0: i32, %arg1: memref<16x4xf32, #tpu.memory_space<vmem>>, %arg2: memref<4x32xf32, #tpu.memory_space<vmem>>, %arg3: memref<1x32xf32, #tpu.memory_space<vmem>>, %arg4: memref<32x32xf32, #tpu.memory_space<vmem>>, %arg5: memref<1x32xf32, #tpu.memory_space<vmem>>, %arg6: memref<4x32xf32, #tpu.memory_space<vmem>>, %arg7: memref<32x32xf32, #tpu.memory_space<vmem>>, %arg8: memref<1x32xf32, #tpu.memory_space<vmem>>, %arg9: memref<32x8xf32, #tpu.memory_space<vmem>>, %arg10: memref<1x8xf32, #tpu.memory_space<vmem>>, %arg11: memref<16x8xf32, #tpu.memory_space<vmem>>) attributes {dimension_semantics = [#tpu.dimension_semantics<parallel>], iteration_bounds = array<i64: 1>, scalar_prefetch = 0 : i64, scratch_operands = 0 : i64, tpu.core_type = #tpu.core_type<tc>, window_params = [{transform_indices = @transform_0, window_bounds = array<i64: 16, 4>}, {pipeline_mode = #tpu.pipeline_mode<synchronous>, transform_indices = @transform_1, window_bounds = array<i64: 4, 32>}, {pipeline_mode = #tpu.pipeline_mode<synchronous>, transform_indices = @transform_2, window_bounds = array<i64: 1, 32>}, {pipeline_mode = #tpu.pipeline_mode<synchronous>, transform_indices = @transform_3, window_bounds = array<i64: 32, 32>}, {pipeline_mode = #tpu.pipeline_mode<synchronous>, transform_indices = @transform_4, window_bounds = array<i64: 1, 32>}, {pipeline_mode = #tpu.pipeline_mode<synchronous>, transform_indices = @transform_5, window_bounds = array<i64: 4, 32>}, {pipeline_mode = #tpu.pipeline_mode<synchronous>, transform_indices = @transform_6, window_bounds = array<i64: 32, 32>}, {pipeline_mode = #tpu.pipeline_mode<synchronous>, transform_indices = @transform_7, window_bounds = array<i64: 1, 32>}, {pipeline_mode = #tpu.pipeline_mode<synchronous>, transform_indices = @transform_8, window_bounds = array<i64: 32, 8>}, {pipeline_mode = #tpu.pipeline_mode<synchronous>, transform_indices = @transform_9, window_bounds = array<i64: 1, 8>}, {transform_indices = @transform_10, window_bounds = array<i64: 16, 8>}]} {
    %c0 = arith.constant 0 : index
    %c0_0 = arith.constant 0 : index
    %0 = vector.load %arg1[%c0, %c0_0] : memref<16x4xf32, #tpu.memory_space<vmem>>, vector<16x4xf32>
    %c0_1 = arith.constant 0 : index
    %c0_2 = arith.constant 0 : index
    %1 = vector.load %arg2[%c0_1, %c0_2] : memref<4x32xf32, #tpu.memory_space<vmem>>, vector<4x32xf32>
    %cst = arith.constant dense<0.000000e+00> : vector<16x32xf32>
    %2 = tpu.matmul %0, %1, %cst {dimension_numbers = #tpu.dot_dimension_numbers<[1], [0], [0], [1], [0, 0, 1, 1], [], []>} : vector<16x4xf32>, vector<4x32xf32>, vector<16x32xf32> -> vector<16x32xf32>
    %c0_3 = arith.constant 0 : index
    %c0_4 = arith.constant 0 : index
    %3 = vector.load %arg3[%c0_3, %c0_4] : memref<1x32xf32, #tpu.memory_space<vmem>>, vector<1x32xf32>
    %4 = vector.broadcast %3 : vector<1x32xf32> to vector<16x32xf32>
    %5 = arith.addf %2, %4 : vector<16x32xf32>
    %cst_5 = arith.constant 0.000000e+00 : f32
    %6 = vector.broadcast %cst_5 : f32 to vector<16x32xf32>
    %7 = arith.maximumf %5, %6 : vector<16x32xf32>
    %c0_6 = arith.constant 0 : index
    %c0_7 = arith.constant 0 : index
    %8 = vector.load %arg4[%c0_6, %c0_7] : memref<32x32xf32, #tpu.memory_space<vmem>>, vector<32x32xf32>
    %cst_8 = arith.constant dense<0.000000e+00> : vector<16x32xf32>
    %9 = tpu.matmul %7, %8, %cst_8 {dimension_numbers = #tpu.dot_dimension_numbers<[1], [0], [0], [1], [0, 0, 1, 1], [], []>} : vector<16x32xf32>, vector<32x32xf32>, vector<16x32xf32> -> vector<16x32xf32>
    %c0_9 = arith.constant 0 : index
    %c0_10 = arith.constant 0 : index
    %10 = vector.load %arg5[%c0_9, %c0_10] : memref<1x32xf32, #tpu.memory_space<vmem>>, vector<1x32xf32>
    %11 = vector.broadcast %10 : vector<1x32xf32> to vector<16x32xf32>
    %12 = arith.addf %9, %11 : vector<16x32xf32>
    %cst_11 = arith.constant 0.000000e+00 : f32
    %13 = vector.broadcast %cst_11 : f32 to vector<16x32xf32>
    %14 = arith.maximumf %12, %13 : vector<16x32xf32>
    %c0_12 = arith.constant 0 : index
    %c0_13 = arith.constant 0 : index
    %15 = vector.load %arg6[%c0_12, %c0_13] : memref<4x32xf32, #tpu.memory_space<vmem>>, vector<4x32xf32>
    %cst_14 = arith.constant dense<0.000000e+00> : vector<16x32xf32>
    %16 = tpu.matmul %0, %15, %cst_14 {dimension_numbers = #tpu.dot_dimension_numbers<[1], [0], [0], [1], [0, 0, 1, 1], [], []>} : vector<16x4xf32>, vector<4x32xf32>, vector<16x32xf32> -> vector<16x32xf32>
    %c0_15 = arith.constant 0 : index
    %c0_16 = arith.constant 0 : index
    %17 = vector.load %arg7[%c0_15, %c0_16] : memref<32x32xf32, #tpu.memory_space<vmem>>, vector<32x32xf32>
    %cst_17 = arith.constant dense<0.000000e+00> : vector<16x32xf32>
    %18 = tpu.matmul %14, %17, %cst_17 {dimension_numbers = #tpu.dot_dimension_numbers<[1], [0], [0], [1], [0, 0, 1, 1], [], []>} : vector<16x32xf32>, vector<32x32xf32>, vector<16x32xf32> -> vector<16x32xf32>
    %19 = arith.addf %16, %18 : vector<16x32xf32>
    %c0_18 = arith.constant 0 : index
    %c0_19 = arith.constant 0 : index
    %20 = vector.load %arg8[%c0_18, %c0_19] : memref<1x32xf32, #tpu.memory_space<vmem>>, vector<1x32xf32>
    %21 = vector.broadcast %20 : vector<1x32xf32> to vector<16x32xf32>
    %22 = arith.addf %19, %21 : vector<16x32xf32>
    %cst_20 = arith.constant 0.000000e+00 : f32
    %23 = vector.broadcast %cst_20 : f32 to vector<16x32xf32>
    %24 = arith.maximumf %22, %23 : vector<16x32xf32>
    %c0_21 = arith.constant 0 : index
    %c0_22 = arith.constant 0 : index
    %25 = vector.load %arg9[%c0_21, %c0_22] : memref<32x8xf32, #tpu.memory_space<vmem>>, vector<32x8xf32>
    %cst_23 = arith.constant dense<0.000000e+00> : vector<16x8xf32>
    %26 = tpu.matmul %24, %25, %cst_23 {dimension_numbers = #tpu.dot_dimension_numbers<[1], [0], [0], [1], [0, 0, 1, 1], [], []>} : vector<16x32xf32>, vector<32x8xf32>, vector<16x8xf32> -> vector<16x8xf32>
    %c0_24 = arith.constant 0 : index
    %c0_25 = arith.constant 0 : index
    %27 = vector.load %arg10[%c0_24, %c0_25] : memref<1x8xf32, #tpu.memory_space<vmem>>, vector<1x8xf32>
    %28 = vector.broadcast %27 : vector<1x8xf32> to vector<16x8xf32>
    %29 = arith.addf %26, %28 : vector<16x8xf32>
    %c0_26 = arith.constant 0 : index
    %c0_27 = arith.constant 0 : index
    %30 = vector.load %arg11[%c0_26, %c0_27] : memref<16x8xf32, #tpu.memory_space<vmem>>, vector<16x8xf32>
    tpu.vector_store %arg11[%c0_26, %c0_27], %29 {strides = array<i32>} : memref<16x8xf32, #tpu.memory_space<vmem>>, vector<16x8xf32>,
    return
  }
  func.func @transform_0(%arg0: i32) -> (i32, i32) {
    %c0_i32 = arith.constant 0 : i32
    %c0_i32_0 = arith.constant 0 : i32
    return %arg0, %c0_i32 : i32, i32
  }
  func.func @transform_1(%arg0: i32) -> (i32, i32) {
    %c0_i32 = arith.constant 0 : i32
    %c0_i32_0 = arith.constant 0 : i32
    %c0_i32_1 = arith.constant 0 : i32
    return %c0_i32, %c0_i32_0 : i32, i32
  }
  func.func @transform_2(%arg0: i32) -> (i32, i32) {
    %c0_i32 = arith.constant 0 : i32
    %c0_i32_0 = arith.constant 0 : i32
    %c0_i32_1 = arith.constant 0 : i32
    return %c0_i32, %c0_i32_0 : i32, i32
  }
  func.func @transform_3(%arg0: i32) -> (i32, i32) {
    %c0_i32 = arith.constant 0 : i32
    %c0_i32_0 = arith.constant 0 : i32
    %c0_i32_1 = arith.constant 0 : i32
    return %c0_i32, %c0_i32_0 : i32, i32
  }
  func.func @transform_4(%arg0: i32) -> (i32, i32) {
    %c0_i32 = arith.constant 0 : i32
    %c0_i32_0 = arith.constant 0 : i32
    %c0_i32_1 = arith.constant 0 : i32
    return %c0_i32, %c0_i32_0 : i32, i32
  }
  func.func @transform_5(%arg0: i32) -> (i32, i32) {
    %c0_i32 = arith.constant 0 : i32
    %c0_i32_0 = arith.constant 0 : i32
    %c0_i32_1 = arith.constant 0 : i32
    return %c0_i32, %c0_i32_0 : i32, i32
  }
  func.func @transform_6(%arg0: i32) -> (i32, i32) {
    %c0_i32 = arith.constant 0 : i32
    %c0_i32_0 = arith.constant 0 : i32
    %c0_i32_1 = arith.constant 0 : i32
    return %c0_i32, %c0_i32_0 : i32, i32
  }
  func.func @transform_7(%arg0: i32) -> (i32, i32) {
    %c0_i32 = arith.constant 0 : i32
    %c0_i32_0 = arith.constant 0 : i32
    %c0_i32_1 = arith.constant 0 : i32
    return %c0_i32, %c0_i32_0 : i32, i32
  }
  func.func @transform_8(%arg0: i32) -> (i32, i32) {
    %c0_i32 = arith.constant 0 : i32
    %c0_i32_0 = arith.constant 0 : i32
    %c0_i32_1 = arith.constant 0 : i32
    return %c0_i32, %c0_i32_0 : i32, i32
  }
  func.func @transform_9(%arg0: i32) -> (i32, i32) {
    %c0_i32 = arith.constant 0 : i32
    %c0_i32_0 = arith.constant 0 : i32
    %c0_i32_1 = arith.constant 0 : i32
    return %c0_i32, %c0_i32_0 : i32, i32
  }
  func.func @transform_10(%arg0: i32) -> (i32, i32) {
    %c0_i32 = arith.constant 0 : i32
    %c0_i32_0 = arith.constant 0 : i32
    return %arg0, %c0_i32 : i32, i32
  }
}

</mosaic_0001>

<bundles_post_ra>
// kernel: tpu_custom_call.1
= control target key start
LH: loop header
LB: loop body
LE: loop exit
PB: predicated region body
PF: predicated region fallthrough
CT: control target
= control target key end

     0   :  { %15 = vsyncpa [#allocation3], 0  ;;  %s649_s13 = smov [#allocation2]   ;;  %s794_s0 = inlined_call_operand.vmem [shape: f32[16,4], index: 0, kind: input, shape index: {}]   ;;  %s795_s1 = inlined_call_operand.hbm [shape: f32[4,32], index: 1, kind: input, shape index: {}]   ;;  %s796_s2 = inlined_call_operand.vmem [shape: f32[1,32], index: 2, kind: input, shape index: {}]   ;;  %s797_s3 = inlined_call_operand.vmem [shape: f32[32,32], index: 3, kind: input, shape index: {}]   ;;  %s798_s4 = inlined_call_operand.vmem [shape: f32[1,32], index: 4, kind: input, shape index: {}]   ;;  %s799_s5 = inlined_call_operand.vmem [shape: f32[4,32], index: 5, kind: input, shape index: {}]   ;;  %s800_s6 = inlined_call_operand.vmem [shape: f32[32,32], index: 6, kind: input, shape index: {}]   ;;  %s801_s7 = inlined_call_operand.vmem [shape: f32[1,32], index: 7, kind: input, shape index: {}]   ;;  %s802_s8 = inlined_call_operand.vmem [shape: f32[32,8], index: 8, kind: input, shape index: {}]   ;;  %s803_s9 = inlined_call_operand.vmem [shape: f32[1,8], index: 9, kind: input, shape index: {}]   ;;  %s804_s10 = inlined_call_operand.vmem [shape: f32[16,8], index: 10, kind: output, shape index: {}]  }
   0x1   :  { %s24_s14 = sshll.u32 %s649_s13, 4  ;;  %s625_s17 = scalar_lea.hbm %s795_s1, 64  ;;  %s25_s14 = int_to_ptr.vmem [resolvable:$true] %s24_s14 }
   0x2   :  { %p626_p0 = scmp.ne.s32.totalorder %s795_s1, %s625_s17  ;;  %p629_p1 = scmp.lt.u32.totalorder %s625_s17, %s795_s1 }
   0x4   :  { %p631_p2 = pnand %p629_p1, %p626_p0 }
   0x6   :  { %634 = shalt.err (!%p631_p2)
}
   0x7   :  { %s635_s22 = scalar_lea.vmem %s25_s14, 64  ;;  %p640_p4 = scmp.lt.s32.totalorder %s25_s14, %s25_s14 }
   0x8   :  { %p636_p3 = scmp.ne.s32.totalorder %s25_s14, %s635_s22  ;;  %p641_p5 = scmp.lt.s32.totalorder %s635_s22, %s635_s22 }
   0xa   :  { %p642_p6 = por %p641_p5, %p640_p4 }
   0xc   :  { %p643_p7 = pnand %p642_p6, %p636_p3 }
   0xe   :  { %646 = shalt.err (!%p643_p7)
}
   0xf   :  { %27 = dma.hbm_to_vmem [thread:$0]  %s795_s1, 64, %s25_s14, [#allocation3]  }
  0x10   :  { %647 = dma.done.wait [#allocation3], 64  }
  0x11   :  { %648 = vsyncadd [#allocation3], 4294967232  ;;  %vm64_vm0 = vcmask 1043456   ;;  %vm57_vm1 = vcmask 31744   ;;  %v49_v0 = vld [vmem:[#allocation2] sm:$0xf] }
  0x12   :  { %v47_v1 = vld [vmem:[%s794_s0] sm:$0xff]  ;;  %v48_v2 = vld [vmem:[%s794_s0 + $0x8] sm:$0xff]  ;;  %555 = vmatprep.subr.msk.mxu0 %vm64_vm0, %v49_v0  ;;  %v147_v6 = vld [vmem:[%s797_s3 + $0x10] sm:$0xff]  ;;  %vm156_vm2 = vcmask 261120   ;;  %vm507_vm3 = vcmask 64512  }
  0x13   :  { %557 = vmatprep.mubr.msk.f32.mxu0 %vm57_vm1, %v47_v1  ;;  %v145_v3 = vld [vmem:[%s797_s3] sm:$0xff]  ;;  %v146_v4 = vld [vmem:[%s797_s3 + $0x8] sm:$0xff]  ;;  %556 = vmatpush3.msk.msra.mxu0 %vm64_vm0, %v49_v0  ;;  %v148_v7 = vld [vmem:[%s797_s3 + $0x18] sm:$0xff] }
  0x14   :  { %v598_v5 = vpack.c.bf16 %v146_v4, %v145_v3  ;;  %558 = vmatmul.mubr.msk.f32.vlgmr.msra.gmra.mrb[0].mxu0 %vm57_vm1, %v48_v2  ;;  %v602_v8 = vpack.c.bf16 %v148_v7, %v147_v6  ;;  %v241_v9 = vld [vmem:[%s800_s6] sm:$0xff]  ;;  %v242_v10 = vld [vmem:[%s800_s6 + $0x8] sm:$0xff]  ;;  %v243_v19 = vld [vmem:[%s800_s6 + $0x10] sm:$0xff] }
  0x15   :  { %v606_v11 = vpack.c.bf16 %v242_v10, %v241_v9  ;;  %v515_v12 = vld [vmem:[%s796_s2] ss:$0 sm:$0xff]  ;;  %v244_v20 = vld [vmem:[%s800_s6 + $0x18] sm:$0xff]  ;;  %v416_v24 = vld [vmem:[%s802_s8 + $0x8] sm:$0xff] }
  0x16   :  { %599 = vmatprep.subr.bf16.mxu1 %v598_v5  ;;  %v610_v21 = vpack.c.bf16 %v244_v20, %v243_v19  ;;  %v240_v22 = vld [vmem:[%s799_s5] sm:$0xf]  ;;  %v417_v33 = vld [vmem:[%s802_s8 + $0x10] sm:$0xff]  ;;  %v418_v34 = vld [vmem:[%s802_s8 + $0x18] sm:$0xff] }
  0x17   :  { %601 = vmatpush3.bf16.msra.mxu1 %v598_v5  ;;  %607 = vmatprep.subr.bf16.mxu0 %v606_v11  ;;  %v415_v23 = vld [vmem:[%s802_s8] sm:$0xff]  ;;  %v618_v35 = vpack.c.bf16 %v418_v34, %v417_v33 }
  0x18   :  { %603 = vmatprep.subr.bf16.mxu1 %v602_v8  ;;  %609 = vmatpush3.bf16.msra.mxu0 %v606_v11  ;;  %v614_v25 = vpack.c.bf16 %v416_v24, %v415_v23  ;;  %v519_v26 = vld [vmem:[%s798_s4] ss:$0 sm:$0xff] }
  0x19   :  { %611 = vmatprep.subr.bf16.mxu0 %v610_v21  ;;  %v527_v36 = vld [vmem:[%s801_s7] ss:$0 sm:$0xff] }
  0x1a   :  { %v528_v43 = vld [vmem:[%s803_s9] ss:$0 sm:$0xff] }
  0x1b   :  { %605 = vmatpush3.bf16.msra.mxu1 %v602_v8 }
  0x1c   :  { %613 = vmatpush3.bf16.msra.mxu0 %v610_v21  ;;  %615 = vmatprep.subr.bf16.mxu1 %v614_v25 }
  0x1d   :  { %582 = vmatprep.subr.msk.mxu0 %vm64_vm0, %v240_v22 }
  0xe7   :  { %v559_v13 = vpop.f32.mrb[0].mxu0 }
  0xe8   :  { %v140_v14 = vadd.f32 %v559_v13, %v515_v12  ;;  %v134_v15 = vpop.f32.mrb[1].mxu0 }
  0xe9   :  { %v135_v16 = vadd.f32 %v515_v12, %v134_v15 }
  0xea   :  { %v144_v18 = vmax.f32 %v140_v14, 0.0 }
  0xeb   :  { %v143_v17 = vmax.f32 %v135_v16, 0.0 }
  0xed   :  { %568 = vmatprep.mubr.msk.f32.mxu1 %vm156_vm2, %v143_v17 }
  0xee   :  { %569 = vmatmul.mubr.msk.f32.vlgmr.msra.gmra.mrb[0].mxu1 %vm156_vm2, %v144_v18 }
  0xef   :  { %617 = vmatpush3.bf16.msra.mxu1 %v614_v25 }
  0xf0   :  { %619 = vmatprep.subr.bf16.mxu1 %v618_v35 }
  0xf3   :  { %621 = vmatpush3.bf16.msra.mxu1 %v618_v35 }
 0x1c1   :  { %v570_v27 = vpop.f32.mrb[0].mxu1 }
 0x1c2   :  { %v235_v28 = vadd.f32 %v570_v27, %v519_v26  ;;  %v229_v29 = vpop.f32.mrb[1].mxu1 }
 0x1c3   :  { %v230_v30 = vadd.f32 %v519_v26, %v229_v29 }
 0x1c4   :  { %v239_v32 = vmax.f32 %v235_v28, 0.0 }
 0x1c5   :  { %v238_v31 = vmax.f32 %v230_v30, 0.0 }
 0x1c7   :  { %579 = vmatprep.mubr.msk.f32.mxu0 %vm156_vm2, %v238_v31 }
 0x1c8   :  { %580 = vmatmul.mubr.msk.f32.vlgmr.msra.gmra.mrb[2].mxu0 %vm156_vm2, %v239_v32 }
 0x1c9   :  { %583 = vmatpush3.msk.msra.mxu0 %vm64_vm0, %v240_v22  ;;  %584 = vmatprep.mubr.msk.f32.mxu0 %vm57_vm1, %v47_v1 }
 0x1d0   :  { %585 = vmatmul.mubr.msk.f32.vlgmr.msra.gmra.mrb[2].mxu0 %vm57_vm1, %v48_v2 }
 0x2a3   :  { %v586_v37 = vpop.f32.mrb[2].mxu0 }
 0x2a4   :  { %v412_v38 = vadd.f32 %v586_v37, %v527_v36  ;;  %v395_v39 = vpop.f32.mrb[3].mxu0 }
 0x2a5   :  { %v411_v40 = vadd.f32 %v527_v36, %v395_v39 }
 0x2a6   :  { %v414_v42 = vmax.f32 %v412_v38, 0.0 }
 0x2a7   :  { %v413_v41 = vmax.f32 %v411_v40, 0.0 }
 0x2a9   :  { %595 = vmatprep.mubr.msk.f32.mxu1 %vm156_vm2, %v413_v41 }
 0x2aa   :  { %596 = vmatmul.mubr.msk.f32.vlgmr.msra.gmra.mrb[2].mxu1 %vm156_vm2, %v414_v42 }
 0x37d   :  { %v597_v44 = vpop.f32.mrb[2].mxu1 }
 0x37e   :  { %v504_v45 = vadd.f32 %v597_v44, %v528_v43  ;;  %v498_v46 = vpop.f32.mrb[3].mxu1 }
 0x37f   :  { %v499_v47 = vadd.f32 %v528_v43, %v498_v46 }
 0x380   :  { %509 = vst.msk [vmem:[%s804_s10 + $0x8] sm:$0xff] %vm507_vm3, %v504_v45 }
 0x381   :  { %508 = vst.msk [vmem:[%s804_s10] sm:$0xff] %vm507_vm3, %v499_v47 }
 0x382   :  { %514 = vsyncpa [#allocation3], 1 }

</bundles_post_ra>
